<compile_context>
chip_gen: v5e
topology: v5e:2x2
jax: 0.10.0
libtpu: 0.0.40
codegen_flags: <defaults>
</compile_context>

<pallas_src>
import math
from functools import partial

import jax
import jax.numpy as jnp
from jax import lax
from jax.experimental import pallas as pl
from jax.experimental.pallas import tpu as pltpu

# ----------------------------- model config ---------------------------------
HIDDEN_DIM = 32
NUM_HEADS = 4
HEAD_DIM = HIDDEN_DIM // NUM_HEADS
BATCH = 2
Q_LEN = 8
KV_LEN = 8


# ------------------------------- kernel -------------------------------------
def cross_attention_kernel(
    scale_ref,   # SMEM (1,)           scale_factor parameter
    xq_ref,      # VMEM (B*Q,  H)      flattened query-domain input
    xkv_ref,     # VMEM (B*KV, H)      flattened key/value-domain input
    w_ref,       # VMEM (H, 4H)        [Wq^T | Wk^T | Wv^T | Wo^T] lane-dense slab
    b_ref,       # VMEM (1, 4H)        [bq | bk | bv | bo]
    out_ref,     # VMEM (B*Q, H)
    *,
    B: int, Q: int, KV: int, num_heads: int,
):
    H = w_ref.shape[0]
    HD = H // num_heads

    # Fold 1/sqrt(head_dim) into the learned scale once.
    scale = scale_ref[0] * (1.0 / math.sqrt(HD))

    w = w_ref[...]                      # (H, 4H)
    b = b_ref[...]                      # (1, 4H)
    wq = w[:, 0:H]                      # (H, H)
    wkv = w[:, H:3 * H]                 # (H, 2H)   [Wk^T | Wv^T]
    wo = w[:, 3 * H:4 * H]              # (H, H)
    bq = b[:, 0:H]
    bkv = b[:, H:3 * H]
    bo = b[:, 3 * H:4 * H]

    xq = xq_ref[...]                    # (B*Q, H)
    xkv = xkv_ref[...]                  # (B*KV, H)

    # Projections: one MXU matmul each, across the whole batch.
    q_all = (jnp.dot(xq, wq, preferred_element_type=jnp.float32) + bq) * scale
    kv_all = jnp.dot(xkv, wkv, preferred_element_type=jnp.float32) + bkv
    # kv_all[:, 0:H] = K, kv_all[:, H:2H] = V

    # NOTE: the module adds `beta` to the scores *before* softmax; softmax is
    # shift-invariant, so this is exactly a no-op on the returned output and is
    # dropped here (dead work removal per perf review).

    for bi in range(B):                 # statically unrolled (B=2)
        q_b = q_all[bi * Q:(bi + 1) * Q, :]           # (Q, H)
        k_b = kv_all[bi * KV:(bi + 1) * KV, 0:H]      # (KV, H)
        v_b = kv_all[bi * KV:(bi + 1) * KV, H:2 * H]  # (KV, H)

        acc = jnp.zeros((Q, H), jnp.float32)
        for h in range(num_heads):      # statically unrolled (4 heads)
            lo, hi = h * HD, (h + 1) * HD
            qh = q_b[:, lo:hi]          # (Q,  HD)
            kh = k_b[:, lo:hi]          # (KV, HD)
            vh = v_b[:, lo:hi]          # (KV, HD)

            # q . k^T with the transpose folded into dot_general dimension numbers.
            s = lax.dot_general(
                qh, kh, (((1,), (1,)), ((), ())),
                preferred_element_type=jnp.float32)   # (Q, KV)

            # softmax over the kv axis (1/sum on the EUP via approx reciprocal)
            s = s - jnp.max(s, axis=-1, keepdims=True)
            p = jnp.exp(s)
            p = p * pl.reciprocal(jnp.sum(p, axis=-1, keepdims=True), approx=True)

            ctx_h = jnp.dot(p, vh, preferred_element_type=jnp.float32)  # (Q, HD)
            # Fold this head's context straight into the output projection:
            # no lane-axis concatenate of per-head contexts.
            acc = acc + jnp.dot(ctx_h, wo[lo:hi, :],
                                preferred_element_type=jnp.float32)     # (Q, H)

        out_ref[bi * Q:(bi + 1) * Q, :] = (acc + bo).astype(out_ref.dtype)


# ------------------------------- wrapper -------------------------------------
@jax.jit
def cross_attention(query_domain, key_value_domain, params):
    B, Q, H = query_domain.shape
    _, KV, _ = key_value_domain.shape

    # Flatten batch*seq so projections are single MXU matmuls.
    xq_flat = query_domain.reshape(B * Q, H)
    xkv_flat = key_value_domain.reshape(B * KV, H)

    # Fused lane-dense weight slab (H, 4H) = (32, 128) and bias slab (1, 4H).
    w_all = jnp.concatenate(
        [params["wq"].T, params["wk"].T, params["wv"].T, params["wo"].T], axis=1)
    b_all = jnp.concatenate(
        [params["bq"], params["bk"], params["bv"], params["bo"]]).reshape(1, 4 * H)
    scale = params["scale_factor"].astype(jnp.float32).reshape(1)
    # `beta` is intentionally not passed: adding it pre-softmax is a no-op.

    kernel = partial(cross_attention_kernel, B=B, Q=Q, KV=KV, num_heads=NUM_HEADS)

    out_flat = pl.pallas_call(
        kernel,
        out_shape=jax.ShapeDtypeStruct((B * Q, H), query_domain.dtype),
        # Single invocation (no grid): whole arrays resident in VMEM/SMEM.
        in_specs=[
            pl.BlockSpec(memory_space=pltpu.MemorySpace.SMEM),   # scale_factor
            pl.BlockSpec(memory_space=pltpu.MemorySpace.VMEM),   # xq  (B*Q, H)
            pl.BlockSpec(memory_space=pltpu.MemorySpace.VMEM),   # xkv (B*KV, H)
            pl.BlockSpec(memory_space=pltpu.MemorySpace.VMEM),   # weight slab (H, 4H)
            pl.BlockSpec(memory_space=pltpu.MemorySpace.VMEM),   # bias slab (1, 4H)
        ],
        out_specs=pl.BlockSpec(memory_space=pltpu.MemorySpace.VMEM),
    )(scale, xq_flat, xkv_flat, w_all, b_all)

    return out_flat.reshape(B, Q, H)


# ----------------------- deterministic parameter init ------------------------
def xavier_uniform(key, shape, gain=1.0):
    fan_in, fan_out = shape[1], shape[0]
    limit = gain * math.sqrt(6.0 / (fan_in + fan_out))
    return jax.random.uniform(key, shape, jnp.float32, -limit, limit)


def init_params(key):
    ks = jax.random.split(key, 4)
    g = 1.0 / math.sqrt(2.0)
    return {
        "wq": xavier_uniform(ks[0], (HIDDEN_DIM, HIDDEN_DIM), gain=g),
        "bq": jnp.zeros((HIDDEN_DIM,), jnp.float32),
        "wk": xavier_uniform(ks[1], (HIDDEN_DIM, HIDDEN_DIM), gain=g),
        "bk": jnp.zeros((HIDDEN_DIM,), jnp.float32),
        "wv": xavier_uniform(ks[2], (HIDDEN_DIM, HIDDEN_DIM), gain=1.0),
        "bv": jnp.zeros((HIDDEN_DIM,), jnp.float32),
        "wo": xavier_uniform(ks[3], (HIDDEN_DIM, HIDDEN_DIM), gain=1.0),
        "bo": jnp.zeros((HIDDEN_DIM,), jnp.float32),
        "scale_factor": jnp.ones((1,), jnp.float32),
        "beta": jnp.zeros((1,), jnp.float32),
    }


# ----------------------------- pure-JAX reference ----------------------------
def reference(query_domain, key_value_domain, params):
    B, Q, H = query_domain.shape
    _, KV, _ = key_value_domain.shape
    q = query_domain @ params["wq"].T + params["bq"]
    k = key_value_domain @ params["wk"].T + params["bk"]
    v = key_value_domain @ params["wv"].T + params["bv"]
    q = q.reshape(B, Q, NUM_HEADS, HEAD_DIM).transpose(0, 2, 1, 3)
    k = k.reshape(B, KV, NUM_HEADS, HEAD_DIM).transpose(0, 2, 1, 3)
    v = v.reshape(B, KV, NUM_HEADS, HEAD_DIM).transpose(0, 2, 1, 3)
    scores = jnp.einsum("bhqd,bhkd->bhqk", q, k) * params["scale_factor"][0]
    scores = scores / math.sqrt(HEAD_DIM)
    attn = jax.nn.softmax(scores + params["beta"][0], axis=-1)
    ctx = jnp.einsum("bhqk,bhkd->bhqd", attn, v)
    ctx = ctx.transpose(0, 2, 1, 3).reshape(B, Q, H)
    return ctx @ params["wo"].T + params["bo"]


# ---------------------------------- main --------------------------------------
if __name__ == "__main__":
    key = jax.random.PRNGKey(0)
    k_params, k_q, k_kv = jax.random.split(key, 3)

    params = init_params(k_params)
    # Non-trivial scale/beta so those code paths are actually exercised.
    params["scale_factor"] = jnp.array([1.3], jnp.float32)
    params["beta"] = jnp.array([0.2], jnp.float32)

    query_domain = jax.random.normal(k_q, (BATCH, Q_LEN, HIDDEN_DIM), jnp.float32)
    key_value_domain = jax.random.normal(k_kv, (BATCH, KV_LEN, HIDDEN_DIM), jnp.float32)

    out = cross_attention(query_domain, key_value_domain, params)
    out = jax.block_until_ready(out)

    ref = reference(query_domain, key_value_domain, params)
    assert out.shape == (BATCH, Q_LEN, HIDDEN_DIM)
    # Tolerance covers the EUP approx-reciprocal used for the softmax denominator.
    assert jnp.allclose(out, ref, atol=2e-3, rtol=2e-3), "mismatch vs reference"

    print("KERNEL_OK")
</pallas_src>

<mosaic_0001>
module attributes {stable_mosaic.version = 11 : i64} {
  func.func @cross_attention_kernel(%arg0: memref<1xf32, #tpu.memory_space<smem>>, %arg1: memref<16x32xf32, #tpu.memory_space<vmem>>, %arg2: memref<16x32xf32, #tpu.memory_space<vmem>>, %arg3: memref<32x128xf32, #tpu.memory_space<vmem>>, %arg4: memref<1x128xf32, #tpu.memory_space<vmem>>, %arg5: memref<16x32xf32, #tpu.memory_space<vmem>>) attributes {dimension_semantics = [], scalar_prefetch = 0 : i64, scratch_operands = 0 : i64, tpu.core_type = #tpu.core_type<tc>} {
    %c0 = arith.constant 0 : index
    %0 = memref.load %arg0[%c0] : memref<1xf32, #tpu.memory_space<smem>>
    %cst = arith.constant 0.353553385 : f32
    %1 = arith.mulf %0, %cst : f32
    %c0_0 = arith.constant 0 : index
    %c0_1 = arith.constant 0 : index
    %2 = vector.load %arg3[%c0_0, %c0_1] : memref<32x128xf32, #tpu.memory_space<vmem>>, vector<32x128xf32>
    %c0_2 = arith.constant 0 : index
    %c0_3 = arith.constant 0 : index
    %3 = vector.load %arg4[%c0_2, %c0_3] : memref<1x128xf32, #tpu.memory_space<vmem>>, vector<1x128xf32>
    %4 = vector.extract_strided_slice %2 {offsets = [0, 0], sizes = [32, 32], strides = [1, 1]} : vector<32x128xf32> to vector<32x32xf32>
    %5 = vector.extract_strided_slice %2 {offsets = [0, 32], sizes = [32, 64], strides = [1, 1]} : vector<32x128xf32> to vector<32x64xf32>
    %6 = vector.extract_strided_slice %2 {offsets = [0, 96], sizes = [32, 32], strides = [1, 1]} : vector<32x128xf32> to vector<32x32xf32>
    %7 = vector.extract_strided_slice %3 {offsets = [0, 0], sizes = [1, 32], strides = [1, 1]} : vector<1x128xf32> to vector<1x32xf32>
    %8 = vector.extract_strided_slice %3 {offsets = [0, 32], sizes = [1, 64], strides = [1, 1]} : vector<1x128xf32> to vector<1x64xf32>
    %9 = vector.extract_strided_slice %3 {offsets = [0, 96], sizes = [1, 32], strides = [1, 1]} : vector<1x128xf32> to vector<1x32xf32>
    %c0_4 = arith.constant 0 : index
    %c0_5 = arith.constant 0 : index
    %10 = vector.load %arg1[%c0_4, %c0_5] : memref<16x32xf32, #tpu.memory_space<vmem>>, vector<16x32xf32>
    %c0_6 = arith.constant 0 : index
    %c0_7 = arith.constant 0 : index
    %11 = vector.load %arg2[%c0_6, %c0_7] : memref<16x32xf32, #tpu.memory_space<vmem>>, vector<16x32xf32>
    %cst_8 = arith.constant dense<0.000000e+00> : vector<16x32xf32>
    %12 = tpu.matmul %10, %4, %cst_8 {dimension_numbers = #tpu.dot_dimension_numbers<[1], [0], [0], [1], [0, 0, 1, 1], [], []>} : vector<16x32xf32>, vector<32x32xf32>, vector<16x32xf32> -> vector<16x32xf32>
    %13 = vector.broadcast %7 : vector<1x32xf32> to vector<16x32xf32>
    %14 = arith.addf %12, %13 : vector<16x32xf32>
    %15 = vector.broadcast %1 : f32 to vector<16x32xf32>
    %16 = arith.mulf %14, %15 : vector<16x32xf32>
    %cst_9 = arith.constant dense<0.000000e+00> : vector<16x64xf32>
    %17 = tpu.matmul %11, %5, %cst_9 {dimension_numbers = #tpu.dot_dimension_numbers<[1], [0], [0], [1], [0, 0, 1, 1], [], []>} : vector<16x32xf32>, vector<32x64xf32>, vector<16x64xf32> -> vector<16x64xf32>
    %18 = vector.broadcast %8 : vector<1x64xf32> to vector<16x64xf32>
    %19 = arith.addf %17, %18 : vector<16x64xf32>
    %20 = vector.extract_strided_slice %16 {offsets = [0, 0], sizes = [8, 32], strides = [1, 1]} : vector<16x32xf32> to vector<8x32xf32>
    %21 = vector.extract_strided_slice %19 {offsets = [0, 0], sizes = [8, 32], strides = [1, 1]} : vector<16x64xf32> to vector<8x32xf32>
    %22 = vector.extract_strided_slice %19 {offsets = [0, 32], sizes = [8, 32], strides = [1, 1]} : vector<16x64xf32> to vector<8x32xf32>
    %cst_10 = arith.constant 0.000000e+00 : f32
    %23 = vector.broadcast %cst_10 : f32 to vector<8x32xf32>
    %24 = vector.extract_strided_slice %20 {offsets = [0, 0], sizes = [8, 8], strides = [1, 1]} : vector<8x32xf32> to vector<8x8xf32>
    %25 = vector.extract_strided_slice %21 {offsets = [0, 0], sizes = [8, 8], strides = [1, 1]} : vector<8x32xf32> to vector<8x8xf32>
    %26 = vector.extract_strided_slice %22 {offsets = [0, 0], sizes = [8, 8], strides = [1, 1]} : vector<8x32xf32> to vector<8x8xf32>
    %cst_11 = arith.constant dense<0.000000e+00> : vector<8x8xf32>
    %27 = tpu.matmul %24, %25, %cst_11 {dimension_numbers = #tpu.dot_dimension_numbers<[1], [1], [0], [0], [0, 0, 1, 0], [], []>} : vector<8x8xf32>, vector<8x8xf32>, vector<8x8xf32> -> vector<8x8xf32>
    %cst_12 = arith.constant dense<0xFF800000> : vector<8xf32>
    %28 = vector.multi_reduction <maximumf>, %27, %cst_12 [1] : vector<8x8xf32> to vector<8xf32>
    %29 = vector.shape_cast %28 : vector<8xf32> to vector<8x1xf32>
    %30 = vector.broadcast %29 : vector<8x1xf32> to vector<8x8xf32>
    %31 = arith.subf %27, %30 : vector<8x8xf32>
    %32 = math.exp %31 : vector<8x8xf32>
    %cst_13 = arith.constant dense<0.000000e+00> : vector<8xf32>
    %33 = vector.multi_reduction <add>, %32, %cst_13 [1] : vector<8x8xf32> to vector<8xf32>
    %34 = vector.shape_cast %33 : vector<8xf32> to vector<8x1xf32>
    %35 = tpu.reciprocal %34 {approx = true} : vector<8x1xf32> -> vector<8x1xf32>
    %36 = vector.broadcast %35 : vector<8x1xf32> to vector<8x8xf32>
    %37 = arith.mulf %32, %36 : vector<8x8xf32>
    %cst_14 = arith.constant dense<0.000000e+00> : vector<8x8xf32>
    %38 = tpu.matmul %37, %26, %cst_14 {dimension_numbers = #tpu.dot_dimension_numbers<[1], [0], [0], [1], [0, 0, 1, 1], [], []>} : vector<8x8xf32>, vector<8x8xf32>, vector<8x8xf32> -> vector<8x8xf32>
    %39 = vector.extract_strided_slice %6 {offsets = [0, 0], sizes = [8, 32], strides = [1, 1]} : vector<32x32xf32> to vector<8x32xf32>
    %cst_15 = arith.constant dense<0.000000e+00> : vector<8x32xf32>
    %40 = tpu.matmul %38, %39, %cst_15 {dimension_numbers = #tpu.dot_dimension_numbers<[1], [0], [0], [1], [0, 0, 1, 1], [], []>} : vector<8x8xf32>, vector<8x32xf32>, vector<8x32xf32> -> vector<8x32xf32>
    %41 = arith.addf %23, %40 : vector<8x32xf32>
    %42 = vector.extract_strided_slice %20 {offsets = [0, 8], sizes = [8, 8], strides = [1, 1]} : vector<8x32xf32> to vector<8x8xf32>
    %43 = vector.extract_strided_slice %21 {offsets = [0, 8], sizes = [8, 8], strides = [1, 1]} : vector<8x32xf32> to vector<8x8xf32>
    %44 = vector.extract_strided_slice %22 {offsets = [0, 8], sizes = [8, 8], strides = [1, 1]} : vector<8x32xf32> to vector<8x8xf32>
    %cst_16 = arith.constant dense<0.000000e+00> : vector<8x8xf32>
    %45 = tpu.matmul %42, %43, %cst_16 {dimension_numbers = #tpu.dot_dimension_numbers<[1], [1], [0], [0], [0, 0, 1, 0], [], []>} : vector<8x8xf32>, vector<8x8xf32>, vector<8x8xf32> -> vector<8x8xf32>
    %cst_17 = arith.constant dense<0xFF800000> : vector<8xf32>
    %46 = vector.multi_reduction <maximumf>, %45, %cst_17 [1] : vector<8x8xf32> to vector<8xf32>
    %47 = vector.shape_cast %46 : vector<8xf32> to vector<8x1xf32>
    %48 = vector.broadcast %47 : vector<8x1xf32> to vector<8x8xf32>
    %49 = arith.subf %45, %48 : vector<8x8xf32>
    %50 = math.exp %49 : vector<8x8xf32>
    %cst_18 = arith.constant dense<0.000000e+00> : vector<8xf32>
    %51 = vector.multi_reduction <add>, %50, %cst_18 [1] : vector<8x8xf32> to vector<8xf32>
    %52 = vector.shape_cast %51 : vector<8xf32> to vector<8x1xf32>
    %53 = tpu.reciprocal %52 {approx = true} : vector<8x1xf32> -> vector<8x1xf32>
    %54 = vector.broadcast %53 : vector<8x1xf32> to vector<8x8xf32>
    %55 = arith.mulf %50, %54 : vector<8x8xf32>
    %cst_19 = arith.constant dense<0.000000e+00> : vector<8x8xf32>
    %56 = tpu.matmul %55, %44, %cst_19 {dimension_numbers = #tpu.dot_dimension_numbers<[1], [0], [0], [1], [0, 0, 1, 1], [], []>} : vector<8x8xf32>, vector<8x8xf32>, vector<8x8xf32> -> vector<8x8xf32>
    %57 = vector.extract_strided_slice %6 {offsets = [8, 0], sizes = [8, 32], strides = [1, 1]} : vector<32x32xf32> to vector<8x32xf32>
    %cst_20 = arith.constant dense<0.000000e+00> : vector<8x32xf32>
    %58 = tpu.matmul %56, %57, %cst_20 {dimension_numbers = #tpu.dot_dimension_numbers<[1], [0], [0], [1], [0, 0, 1, 1], [], []>} : vector<8x8xf32>, vector<8x32xf32>, vector<8x32xf32> -> vector<8x32xf32>
    %59 = arith.addf %41, %58 : vector<8x32xf32>
    %60 = vector.extract_strided_slice %20 {offsets = [0, 16], sizes = [8, 8], strides = [1, 1]} : vector<8x32xf32> to vector<8x8xf32>
    %61 = vector.extract_strided_slice %21 {offsets = [0, 16], sizes = [8, 8], strides = [1, 1]} : vector<8x32xf32> to vector<8x8xf32>
    %62 = vector.extract_strided_slice %22 {offsets = [0, 16], sizes = [8, 8], strides = [1, 1]} : vector<8x32xf32> to vector<8x8xf32>
    %cst_21 = arith.constant dense<0.000000e+00> : vector<8x8xf32>
    %63 = tpu.matmul %60, %61, %cst_21 {dimension_numbers = #tpu.dot_dimension_numbers<[1], [1], [0], [0], [0, 0, 1, 0], [], []>} : vector<8x8xf32>, vector<8x8xf32>, vector<8x8xf32> -> vector<8x8xf32>
    %cst_22 = arith.constant dense<0xFF800000> : vector<8xf32>
    %64 = vector.multi_reduction <maximumf>, %63, %cst_22 [1] : vector<8x8xf32> to vector<8xf32>
    %65 = vector.shape_cast %64 : vector<8xf32> to vector<8x1xf32>
    %66 = vector.broadcast %65 : vector<8x1xf32> to vector<8x8xf32>
    %67 = arith.subf %63, %66 : vector<8x8xf32>
    %68 = math.exp %67 : vector<8x8xf32>
    %cst_23 = arith.constant dense<0.000000e+00> : vector<8xf32>
    %69 = vector.multi_reduction <add>, %68, %cst_23 [1] : vector<8x8xf32> to vector<8xf32>
    %70 = vector.shape_cast %69 : vector<8xf32> to vector<8x1xf32>
    %71 = tpu.reciprocal %70 {approx = true} : vector<8x1xf32> -> vector<8x1xf32>
    %72 = vector.broadcast %71 : vector<8x1xf32> to vector<8x8xf32>
    %73 = arith.mulf %68, %72 : vector<8x8xf32>
    %cst_24 = arith.constant dense<0.000000e+00> : vector<8x8xf32>
    %74 = tpu.matmul %73, %62, %cst_24 {dimension_numbers = #tpu.dot_dimension_numbers<[1], [0], [0], [1], [0, 0, 1, 1], [], []>} : vector<8x8xf32>, vector<8x8xf32>, vector<8x8xf32> -> vector<8x8xf32>
    %75 = vector.extract_strided_slice %6 {offsets = [16, 0], sizes = [8, 32], strides = [1, 1]} : vector<32x32xf32> to vector<8x32xf32>
    %cst_25 = arith.constant dense<0.000000e+00> : vector<8x32xf32>
    %76 = tpu.matmul %74, %75, %cst_25 {dimension_numbers = #tpu.dot_dimension_numbers<[1], [0], [0], [1], [0, 0, 1, 1], [], []>} : vector<8x8xf32>, vector<8x32xf32>, vector<8x32xf32> -> vector<8x32xf32>
    %77 = arith.addf %59, %76 : vector<8x32xf32>
    %78 = vector.extract_strided_slice %20 {offsets = [0, 24], sizes = [8, 8], strides = [1, 1]} : vector<8x32xf32> to vector<8x8xf32>
    %79 = vector.extract_strided_slice %21 {offsets = [0, 24], sizes = [8, 8], strides = [1, 1]} : vector<8x32xf32> to vector<8x8xf32>
    %80 = vector.extract_strided_slice %22 {offsets = [0, 24], sizes = [8, 8], strides = [1, 1]} : vector<8x32xf32> to vector<8x8xf32>
    %cst_26 = arith.constant dense<0.000000e+00> : vector<8x8xf32>
    %81 = tpu.matmul %78, %79, %cst_26 {dimension_numbers = #tpu.dot_dimension_numbers<[1], [1], [0], [0], [0, 0, 1, 0], [], []>} : vector<8x8xf32>, vector<8x8xf32>, vector<8x8xf32> -> vector<8x8xf32>
    %cst_27 = arith.constant dense<0xFF800000> : vector<8xf32>
    %82 = vector.multi_reduction <maximumf>, %81, %cst_27 [1] : vector<8x8xf32> to vector<8xf32>
    %83 = vector.shape_cast %82 : vector<8xf32> to vector<8x1xf32>
    %84 = vector.broadcast %83 : vector<8x1xf32> to vector<8x8xf32>
    %85 = arith.subf %81, %84 : vector<8x8xf32>
    %86 = math.exp %85 : vector<8x8xf32>
    %cst_28 = arith.constant dense<0.000000e+00> : vector<8xf32>
    %87 = vector.multi_reduction <add>, %86, %cst_28 [1] : vector<8x8xf32> to vector<8xf32>
    %88 = vector.shape_cast %87 : vector<8xf32> to vector<8x1xf32>
    %89 = tpu.reciprocal %88 {approx = true} : vector<8x1xf32> -> vector<8x1xf32>
    %90 = vector.broadcast %89 : vector<8x1xf32> to vector<8x8xf32>
    %91 = arith.mulf %86, %90 : vector<8x8xf32>
    %cst_29 = arith.constant dense<0.000000e+00> : vector<8x8xf32>
    %92 = tpu.matmul %91, %80, %cst_29 {dimension_numbers = #tpu.dot_dimension_numbers<[1], [0], [0], [1], [0, 0, 1, 1], [], []>} : vector<8x8xf32>, vector<8x8xf32>, vector<8x8xf32> -> vector<8x8xf32>
    %93 = vector.extract_strided_slice %6 {offsets = [24, 0], sizes = [8, 32], strides = [1, 1]} : vector<32x32xf32> to vector<8x32xf32>
    %cst_30 = arith.constant dense<0.000000e+00> : vector<8x32xf32>
    %94 = tpu.matmul %92, %93, %cst_30 {dimension_numbers = #tpu.dot_dimension_numbers<[1], [0], [0], [1], [0, 0, 1, 1], [], []>} : vector<8x8xf32>, vector<8x32xf32>, vector<8x32xf32> -> vector<8x32xf32>
    %95 = arith.addf %77, %94 : vector<8x32xf32>
    %96 = vector.broadcast %9 : vector<1x32xf32> to vector<8x32xf32>
    %97 = arith.addf %95, %96 : vector<8x32xf32>
    %c0_31 = arith.constant 0 : index
    %c0_32 = arith.constant 0 : index
    %98 = vector.load %arg5[%c0_31, %c0_32] : memref<16x32xf32, #tpu.memory_space<vmem>>, vector<8x32xf32>
    tpu.vector_store %arg5[%c0_31, %c0_32], %97 {strides = array<i32>} : memref<16x32xf32, #tpu.memory_space<vmem>>, vector<8x32xf32>,
    %99 = vector.extract_strided_slice %16 {offsets = [8, 0], sizes = [8, 32], strides = [1, 1]} : vector<16x32xf32> to vector<8x32xf32>
    %100 = vector.extract_strided_slice %19 {offsets = [8, 0], sizes = [8, 32], strides = [1, 1]} : vector<16x64xf32> to vector<8x32xf32>
    %101 = vector.extract_strided_slice %19 {offsets = [8, 32], sizes = [8, 32], strides = [1, 1]} : vector<16x64xf32> to vector<8x32xf32>
    %cst_33 = arith.constant 0.000000e+00 : f32
    %102 = vector.broadcast %cst_33 : f32 to vector<8x32xf32>
    %103 = vector.extract_strided_slice %99 {offsets = [0, 0], sizes = [8, 8], strides = [1, 1]} : vector<8x32xf32> to vector<8x8xf32>
    %104 = vector.extract_strided_slice %100 {offsets = [0, 0], sizes = [8, 8], strides = [1, 1]} : vector<8x32xf32> to vector<8x8xf32>
    %105 = vector.extract_strided_slice %101 {offsets = [0, 0], sizes = [8, 8], strides = [1, 1]} : vector<8x32xf32> to vector<8x8xf32>
    %cst_34 = arith.constant dense<0.000000e+00> : vector<8x8xf32>
    %106 = tpu.matmul %103, %104, %cst_34 {dimension_numbers = #tpu.dot_dimension_numbers<[1], [1], [0], [0], [0, 0, 1, 0], [], []>} : vector<8x8xf32>, vector<8x8xf32>, vector<8x8xf32> -> vector<8x8xf32>
    %cst_35 = arith.constant dense<0xFF800000> : vector<8xf32>
    %107 = vector.multi_reduction <maximumf>, %106, %cst_35 [1] : vector<8x8xf32> to vector<8xf32>
    %108 = vector.shape_cast %107 : vector<8xf32> to vector<8x1xf32>
    %109 = vector.broadcast %108 : vector<8x1xf32> to vector<8x8xf32>
    %110 = arith.subf %106, %109 : vector<8x8xf32>
    %111 = math.exp %110 : vector<8x8xf32>
    %cst_36 = arith.constant dense<0.000000e+00> : vector<8xf32>
    %112 = vector.multi_reduction <add>, %111, %cst_36 [1] : vector<8x8xf32> to vector<8xf32>
    %113 = vector.shape_cast %112 : vector<8xf32> to vector<8x1xf32>
    %114 = tpu.reciprocal %113 {approx = true} : vector<8x1xf32> -> vector<8x1xf32>
    %115 = vector.broadcast %114 : vector<8x1xf32> to vector<8x8xf32>
    %116 = arith.mulf %111, %115 : vector<8x8xf32>
    %cst_37 = arith.constant dense<0.000000e+00> : vector<8x8xf32>
    %117 = tpu.matmul %116, %105, %cst_37 {dimension_numbers = #tpu.dot_dimension_numbers<[1], [0], [0], [1], [0, 0, 1, 1], [], []>} : vector<8x8xf32>, vector<8x8xf32>, vector<8x8xf32> -> vector<8x8xf32>
    %118 = vector.extract_strided_slice %6 {offsets = [0, 0], sizes = [8, 32], strides = [1, 1]} : vector<32x32xf32> to vector<8x32xf32>
    %cst_38 = arith.constant dense<0.000000e+00> : vector<8x32xf32>
    %119 = tpu.matmul %117, %118, %cst_38 {dimension_numbers = #tpu.dot_dimension_numbers<[1], [0], [0], [1], [0, 0, 1, 1], [], []>} : vector<8x8xf32>, vector<8x32xf32>, vector<8x32xf32> -> vector<8x32xf32>
    %120 = arith.addf %102, %119 : vector<8x32xf32>
    %121 = vector.extract_strided_slice %99 {offsets = [0, 8], sizes = [8, 8], strides = [1, 1]} : vector<8x32xf32> to vector<8x8xf32>
    %122 = vector.extract_strided_slice %100 {offsets = [0, 8], sizes = [8, 8], strides = [1, 1]} : vector<8x32xf32> to vector<8x8xf32>
    %123 = vector.extract_strided_slice %101 {offsets = [0, 8], sizes = [8, 8], strides = [1, 1]} : vector<8x32xf32> to vector<8x8xf32>
    %cst_39 = arith.constant dense<0.000000e+00> : vector<8x8xf32>
    %124 = tpu.matmul %121, %122, %cst_39 {dimension_numbers = #tpu.dot_dimension_numbers<[1], [1], [0], [0], [0, 0, 1, 0], [], []>} : vector<8x8xf32>, vector<8x8xf32>, vector<8x8xf32> -> vector<8x8xf32>
    %cst_40 = arith.constant dense<0xFF800000> : vector<8xf32>
    %125 = vector.multi_reduction <maximumf>, %124, %cst_40 [1] : vector<8x8xf32> to vector<8xf32>
    %126 = vector.shape_cast %125 : vector<8xf32> to vector<8x1xf32>
    %127 = vector.broadcast %126 : vector<8x1xf32> to vector<8x8xf32>
    %128 = arith.subf %124, %127 : vector<8x8xf32>
    %129 = math.exp %128 : vector<8x8xf32>
    %cst_41 = arith.constant dense<0.000000e+00> : vector<8xf32>
    %130 = vector.multi_reduction <add>, %129, %cst_41 [1] : vector<8x8xf32> to vector<8xf32>
    %131 = vector.shape_cast %130 : vector<8xf32> to vector<8x1xf32>
    %132 = tpu.reciprocal %131 {approx = true} : vector<8x1xf32> -> vector<8x1xf32>
    %133 = vector.broadcast %132 : vector<8x1xf32> to vector<8x8xf32>
    %134 = arith.mulf %129, %133 : vector<8x8xf32>
    %cst_42 = arith.constant dense<0.000000e+00> : vector<8x8xf32>
    %135 = tpu.matmul %134, %123, %cst_42 {dimension_numbers = #tpu.dot_dimension_numbers<[1], [0], [0], [1], [0, 0, 1, 1], [], []>} : vector<8x8xf32>, vector<8x8xf32>, vector<8x8xf32> -> vector<8x8xf32>
    %136 = vector.extract_strided_slice %6 {offsets = [8, 0], sizes = [8, 32], strides = [1, 1]} : vector<32x32xf32> to vector<8x32xf32>
    %cst_43 = arith.constant dense<0.000000e+00> : vector<8x32xf32>
    %137 = tpu.matmul %135, %136, %cst_43 {dimension_numbers = #tpu.dot_dimension_numbers<[1], [0], [0], [1], [0, 0, 1, 1], [], []>} : vector<8x8xf32>, vector<8x32xf32>, vector<8x32xf32> -> vector<8x32xf32>
    %138 = arith.addf %120, %137 : vector<8x32xf32>
    %139 = vector.extract_strided_slice %99 {offsets = [0, 16], sizes = [8, 8], strides = [1, 1]} : vector<8x32xf32> to vector<8x8xf32>
    %140 = vector.extract_strided_slice %100 {offsets = [0, 16], sizes = [8, 8], strides = [1, 1]} : vector<8x32xf32> to vector<8x8xf32>
    %141 = vector.extract_strided_slice %101 {offsets = [0, 16], sizes = [8, 8], strides = [1, 1]} : vector<8x32xf32> to vector<8x8xf32>
    %cst_44 = arith.constant dense<0.000000e+00> : vector<8x8xf32>
    %142 = tpu.matmul %139, %140, %cst_44 {dimension_numbers = #tpu.dot_dimension_numbers<[1], [1], [0], [0], [0, 0, 1, 0], [], []>} : vector<8x8xf32>, vector<8x8xf32>, vector<8x8xf32> -> vector<8x8xf32>
    %cst_45 = arith.constant dense<0xFF800000> : vector<8xf32>
    %143 = vector.multi_reduction <maximumf>, %142, %cst_45 [1] : vector<8x8xf32> to vector<8xf32>
    %144 = vector.shape_cast %143 : vector<8xf32> to vector<8x1xf32>
    %145 = vector.broadcast %144 : vector<8x1xf32> to vector<8x8xf32>
    %146 = arith.subf %142, %145 : vector<8x8xf32>
    %147 = math.exp %146 : vector<8x8xf32>
    %cst_46 = arith.constant dense<0.000000e+00> : vector<8xf32>
    %148 = vector.multi_reduction <add>, %147, %cst_46 [1] : vector<8x8xf32> to vector<8xf32>
    %149 = vector.shape_cast %148 : vector<8xf32> to vector<8x1xf32>
    %150 = tpu.reciprocal %149 {approx = true} : vector<8x1xf32> -> vector<8x1xf32>
    %151 = vector.broadcast %150 : vector<8x1xf32> to vector<8x8xf32>
    %152 = arith.mulf %147, %151 : vector<8x8xf32>
    %cst_47 = arith.constant dense<0.000000e+00> : vector<8x8xf32>
    %153 = tpu.matmul %152, %141, %cst_47 {dimension_numbers = #tpu.dot_dimension_numbers<[1], [0], [0], [1], [0, 0, 1, 1], [], []>} : vector<8x8xf32>, vector<8x8xf32>, vector<8x8xf32> -> vector<8x8xf32>
    %154 = vector.extract_strided_slice %6 {offsets = [16, 0], sizes = [8, 32], strides = [1, 1]} : vector<32x32xf32> to vector<8x32xf32>
    %cst_48 = arith.constant dense<0.000000e+00> : vector<8x32xf32>
    %155 = tpu.matmul %153, %154, %cst_48 {dimension_numbers = #tpu.dot_dimension_numbers<[1], [0], [0], [1], [0, 0, 1, 1], [], []>} : vector<8x8xf32>, vector<8x32xf32>, vector<8x32xf32> -> vector<8x32xf32>
    %156 = arith.addf %138, %155 : vector<8x32xf32>
    %157 = vector.extract_strided_slice %99 {offsets = [0, 24], sizes = [8, 8], strides = [1, 1]} : vector<8x32xf32> to vector<8x8xf32>
    %158 = vector.extract_strided_slice %100 {offsets = [0, 24], sizes = [8, 8], strides = [1, 1]} : vector<8x32xf32> to vector<8x8xf32>
    %159 = vector.extract_strided_slice %101 {offsets = [0, 24], sizes = [8, 8], strides = [1, 1]} : vector<8x32xf32> to vector<8x8xf32>
    %cst_49 = arith.constant dense<0.000000e+00> : vector<8x8xf32>
    %160 = tpu.matmul %157, %158, %cst_49 {dimension_numbers = #tpu.dot_dimension_numbers<[1], [1], [0], [0], [0, 0, 1, 0], [], []>} : vector<8x8xf32>, vector<8x8xf32>, vector<8x8xf32> -> vector<8x8xf32>
    %cst_50 = arith.constant dense<0xFF800000> : vector<8xf32>
    %161 = vector.multi_reduction <maximumf>, %160, %cst_50 [1] : vector<8x8xf32> to vector<8xf32>
    %162 = vector.shape_cast %161 : vector<8xf32> to vector<8x1xf32>
    %163 = vector.broadcast %162 : vector<8x1xf32> to vector<8x8xf32>
    %164 = arith.subf %160, %163 : vector<8x8xf32>
    %165 = math.exp %164 : vector<8x8xf32>
    %cst_51 = arith.constant dense<0.000000e+00> : vector<8xf32>
    %166 = vector.multi_reduction <add>, %165, %cst_51 [1] : vector<8x8xf32> to vector<8xf32>
    %167 = vector.shape_cast %166 : vector<8xf32> to vector<8x1xf32>
    %168 = tpu.reciprocal %167 {approx = true} : vector<8x1xf32> -> vector<8x1xf32>
    %169 = vector.broadcast %168 : vector<8x1xf32> to vector<8x8xf32>
    %170 = arith.mulf %165, %169 : vector<8x8xf32>
    %cst_52 = arith.constant dense<0.000000e+00> : vector<8x8xf32>
    %171 = tpu.matmul %170, %159, %cst_52 {dimension_numbers = #tpu.dot_dimension_numbers<[1], [0], [0], [1], [0, 0, 1, 1], [], []>} : vector<8x8xf32>, vector<8x8xf32>, vector<8x8xf32> -> vector<8x8xf32>
    %172 = vector.extract_strided_slice %6 {offsets = [24, 0], sizes = [8, 32], strides = [1, 1]} : vector<32x32xf32> to vector<8x32xf32>
    %cst_53 = arith.constant dense<0.000000e+00> : vector<8x32xf32>
    %173 = tpu.matmul %171, %172, %cst_53 {dimension_numbers = #tpu.dot_dimension_numbers<[1], [0], [0], [1], [0, 0, 1, 1], [], []>} : vector<8x8xf32>, vector<8x32xf32>, vector<8x32xf32> -> vector<8x32xf32>
    %174 = arith.addf %156, %173 : vector<8x32xf32>
    %175 = vector.broadcast %9 : vector<1x32xf32> to vector<8x32xf32>
    %176 = arith.addf %174, %175 : vector<8x32xf32>
    %c8 = arith.constant 8 : index
    %c0_54 = arith.constant 0 : index
    %177 = vector.load %arg5[%c8, %c0_54] : memref<16x32xf32, #tpu.memory_space<vmem>>, vector<8x32xf32>
    tpu.vector_store %arg5[%c8, %c0_54], %176 {strides = array<i32>} : memref<16x32xf32, #tpu.memory_space<vmem>>, vector<8x32xf32>,
    return
  }
}

</mosaic_0001>

<bundles_post_ra>
// kernel: cross_attention.1
= control target key start
LH: loop header
LB: loop body
LE: loop exit
PB: predicated region body
PF: predicated region fallthrough
CT: control target
= control target key end

     0   :  { %s1194_s0 = inlined_call_operand.<no memory space> [shape: f32[1], index: 0, kind: input, shape index: {}]   ;;  %s1195_s1 = inlined_call_operand.vmem [shape: f32[16,32], index: 1, kind: input, shape index: {}]   ;;  %s1196_s2 = inlined_call_operand.vmem [shape: f32[16,32], index: 2, kind: input, shape index: {}]   ;;  %s1197_s3 = inlined_call_operand.vmem [shape: f32[32,128], index: 3, kind: input, shape index: {}]   ;;  %s1198_s4 = inlined_call_operand.vmem [shape: f32[1,128], index: 4, kind: input, shape index: {}]   ;;  %s1199_s5 = inlined_call_operand.hbm [shape: f32[16,32], index: 5, kind: output, shape index: {}]  }
   0x1   :  { %v1019_v0 = vld [vmem:[%s1197_s3 + $0x10] sm:$0xff]  ;;  %v1024_v1 = vld [vmem:[%s1197_s3 + $0x18] sm:$0xff] }
   0x2   :  { %v906_v2 = vpack.i.bf16 %v1019_v0, %v1024_v1  ;;  %55 = vmatpush.msra.mxu0 %v1024_v1 }
   0x3   :  { %11 = vsyncpa [#allocation4], 0  ;;  %s975_s22 = smov 96   ;;  %v1034_v3 = vld [vmem:[%s1197_s3] sm:$0xff]  ;;  %v1039_v4 = vld [vmem:[%s1197_s3 + $0x8] sm:$0xff]  ;;  %vm36_vm0 = vcmask 261120  }
   0x4   :  { %907 = vrot.lane.b32.xlu0 %v906_v2, %s975_s22  ;;  %56 = vmatpush.msra.mxu0 %v1019_v0  ;;  %v911_v5 = vpack.i.bf16 %v1034_v3, %v1039_v4  ;;  %v29_v6 = vld [vmem:[%s1195_s1] sm:$0xff]  ;;  %v32_v15 = vld [vmem:[%s1196_s2 + $0x8] sm:$0xff]  ;;  %s23_s10 = smul.f32 0.35355338, %s1194_s0  ;;  %vm117_vm1 = vcmask 64512   ;;  %s977_s0 = smov 112  }
   0x5   :  { %v1053_v7 = vld [vmem:[%s1198_s4] ss:$0 sm:$0xff]  ;;  %v30_v34 = vld [vmem:[%s1195_s1 + $0x8] sm:$0xff]  ;;  %s978_s1 = smov 80   ;;  %s979_s13 = smov 104  }
   0x6   :  { %57 = vmatpush.msra.mxu0 %v1039_v4  ;;  %85 = vrot.lane.b32.xlu1 %v1053_v7, %s975_s22  ;;  %v31_v14 = vld [vmem:[%s1196_s2] sm:$0xff]  ;;  %v1071_v20 = vstv %s23_s10  ;;  %s976_s2 = smov 120   ;;  %s980_s14 = smov 32  }
   0x7   :  { %s981_s15 = smov 88   ;;  %s982_s16 = smov 72  }
   0x8   :  { %58 = vmatpush.msra.mxu0 %v1034_v3  ;;  %s983_s17 = smov [#allocation3]   ;;  %s847_s21 = sshll.u32 %s1199_s5, 4  ;;  %s848_s21 = int_to_ptr.hbm [resolvable:$true] %s847_s21 }
   0x9   :  { %859 = vmatmul.msk.f32.vlgmr.msra.gmra.mxu0 %vm36_vm0, %v29_v6  ;;  %s845_s18 = sshll.u32 %s983_s17, 4  ;;  %s985_s23 = smov 8   ;;  %s846_s18 = int_to_ptr.vmem [resolvable:$true] %s845_s18 }
   0xc   :  { %912 = vrot.lane.b32.xlu0 %v911_v5, %s975_s22 }
  0x11   :  { %860 = vmatmul.msk.f32.gmra.mxu0 %vm36_vm0, %v30_v34 }
  0x76   :  { %v908_v8 = vpop.permute.xlu0 %907 }
  0x77   :  { %v909_v9 = vunpack.i.l.bf16 %v908_v8  ;;  %v910_v10 = vunpack.i.h.bf16 %v908_v8 }
  0x78   :  { %v1068_v17 = vpop.permute.xlu1 %85 }
  0x79   :  { %106 = vmatpush.msra.mxu1 %v909_v9 }
  0x7b   :  { %107 = vmatpush.msra.mxu1 %v910_v10 }
  0x7e   :  { %v913_v11 = vpop.permute.xlu0 %912 }
  0x7f   :  { %v914_v12 = vunpack.i.l.bf16 %v913_v11  ;;  %v915_v13 = vunpack.i.h.bf16 %v913_v11 }
  0x81   :  { %108 = vmatpush.msra.mxu1 %v914_v12 }
  0x83   :  { %109 = vmatpush.msra.mxu1 %v915_v13 }
  0x84   :  { %861 = vmatmul.msk.f32.vlgmr.msra.gmra.mxu1 %vm36_vm0, %v31_v14 }
  0x86   :  { %v60_v16 = vpop.f32.mrf.mxu0 }
  0x87   :  { %v61_v18 = vadd.f32 %v1053_v7, %v60_v16 }
  0x89   :  { %v67_v22 = vmul.f32 %v1071_v20, %v61_v18 }
  0x8c   :  { %862 = vmatmul.msk.f32.gmra.mxu1 %vm36_vm0, %v32_v15 }
  0x8e   :  { %v1099_v39 = vpop.f32.mrf.mxu0 }
  0x8f   :  { %v64_v11 = vadd.f32 %v1053_v7, %v1099_v39 }
  0x91   :  { %v68_v12 = vmul.f32 %v1071_v20, %v64_v11 }
 0x101   :  { %v111_v19 = vpop.f32.mrf.mxu1 }
 0x102   :  { %v1074_v21 = vadd.f32 %v111_v19, %v1068_v17 }
 0x104   :  { %183 = vrot.lane.b32.xlu0 %v1074_v21, %s976_s2  ;;  %155 = vrot.lane.b32.xlu2 %v1074_v21, %s975_s22 }
 0x105   :  { %863 = vmatpush.xpose.msk.msra.mxu2 %vm117_vm1, %v1074_v21 }
 0x108   :  { %864 = vmatmul.msk.f32.vlgmr.msra.gmra.mxu2 %vm117_vm1, %v67_v22 }
 0x109   :  { %v114_v56 = vpop.f32.mrf.mxu1 }
 0x10a   :  { %v1111_v57 = vadd.f32 %v114_v56, %v1068_v17 }
 0x10c   :  { %181 = vrot.lane.b32.xlu0 %v67_v22, %s976_s2 }
 0x114   :  { %300 = vrot.lane.b32.xlu0 %v1074_v21, %s977_s0 }
 0x15e   :  { %v156_v23 = vpop.permute.xlu2 %155 }
 0x15f   :  { %176 = vmatpush.msra.mxu3 %v156_v23 }
 0x176   :  { %v184_v24 = vpop.permute.xlu0 %183 }
 0x177   :  { %866 = vmatpush.xpose.msk.msrb.mxu3 %vm117_vm1, %v184_v24 }
 0x17e   :  { %v182_v25 = vpop.permute.xlu0 %181 }
 0x186   :  { %v301_v26 = vpop.permute.xlu0 %300 }
 0x187   :  { %871 = vmatpush.xpose.msk.msrb.mxu0 %vm117_vm1, %v301_v26 }
 0x18b   :  { %v141_v27 = vpop.f32.mrf.mxu2 }
 0x18c   :  { %v144_v28 = vsel %vm117_vm1, %v141_v27, -inf }
 0x18d   :  { %145 = vmax.xlane.f32.xlu1 %v144_v28 }
 0x200   :  { %v146_v29 = vpop.xlane.xlu1 %145 }
 0x201   :  { %v147_v30 = vsub.f32 %v141_v27, %v146_v29 }
 0x203   :  { %v148_v31 = vmul.f32 1.442695, %v147_v30 }
 0x205   :  { %917 = vpow2.f32 %v148_v31 }
 0x20b   :  { %v918_v32 = vpop.eup %917 }
 0x20c   :  { %v150_v33 = vsel %vm117_vm1, %v918_v32, 0.0 }
 0x20d   :  { %151 = vadd.xlane.f32.xlu2 %v150_v33 }
 0x225   :  { %298 = vrot.lane.b32.xlu2 %v67_v22, %s977_s0 }
 0x280   :  { %v152_v35 = vpop.xlane.xlu2 %151 }
 0x281   :  { %919 = vrcp.f32 %v152_v35 }
 0x287   :  { %v920_v36 = vpop.eup %919 }
 0x288   :  { %v299_v37 = vpop.permute.xlu2 %298  ;;  %v154_v38 = vmul.f32 %v920_v36, %v918_v32 }
 0x289   :  { %872 = vmatmul.msk.f32.vlgmr.msrb.gmra.mxu0 %vm117_vm1, %v299_v37 }
 0x28a   :  { %865 = vmatmul.msk.f32.vlgmr.msra.gmra.mxu3 %vm117_vm1, %v154_v38 }
 0x292   :  { %867 = vmatmul.msk.f32.vlgmr.msrb.gmra.mxu3 %vm117_vm1, %v182_v25 }
 0x306   :  { %v323_v40 = vpop.f32.mrf.mxu0 }
 0x307   :  { %v326_v41 = vsel %vm117_vm1, %v323_v40, -inf }
 0x308   :  { %327 = vmax.xlane.f32.xlu2 %v326_v41 }
 0x30d   :  { %v178_v42 = vpop.f32.mrf.mxu3 }
 0x315   :  { %v206_v43 = vpop.f32.mrf.mxu3 }
 0x316   :  { %v209_v44 = vsel %vm117_vm1, %v206_v43, -inf }
 0x317   :  { %210 = vmax.xlane.f32.xlu0 %v209_v44 }
 0x32b   :  { %337 = vrot.lane.b32.xlu0 %v1074_v21, %s978_s1 }
 0x333   :  { %390 = vrot.lane.b32.xlu0 %v67_v22, %s979_s13 }
 0x37b   :  { %v328_v45 = vpop.xlane.xlu2 %327 }
 0x37c   :  { %v329_v46 = vsub.f32 %v323_v40, %v328_v45 }
 0x37e   :  { %v330_v47 = vmul.f32 1.442695, %v329_v46 }
 0x380   :  { %921 = vpow2.f32 %v330_v47 }
 0x386   :  { %v922_v48 = vpop.eup %921 }
 0x387   :  { %v332_v49 = vsel %vm117_vm1, %v922_v48, 0.0 }
 0x388   :  { %333 = vadd.xlane.f32.xlu2 %v332_v49 }
 0x38a   :  { %v211_v50 = vpop.xlane.xlu0 %210 }
 0x38b   :  { %v212_v51 = vsub.f32 %v206_v43, %v211_v50 }
 0x38d   :  { %v213_v52 = vmul.f32 1.442695, %v212_v51 }
 0x38f   :  { %923 = vpow2.f32 %v213_v52 }
 0x395   :  { %v924_v53 = vpop.eup %923 }
 0x396   :  { %v215_v54 = vsel %vm117_vm1, %v924_v53, 0.0 }
 0x397   :  { %216 = vadd.xlane.f32.xlu1 %v215_v54 }
 0x39d   :  { %v338_v55 = vpop.permute.xlu0 %337 }
 0x39e   :  { %358 = vmatpush.msrb.mxu1 %v338_v55 }
 0x3a0   :  { %363 = vrot.lane.b32.xlu2 %v1019_v0, %s980_s14 }
 0x3a5   :  { %v391_v8 = vpop.permute.xlu0 %390 }
 0x3a8   :  { %524 = vrot.lane.b32.xlu2 %v1111_v57, %s975_s22  ;;  %s984_s22 = smov 128  }
 0x3b0   :  { %220 = vrot.lane.b32.xlu1 %v1074_v21, %s981_s15 }
 0x3b8   :  { %246 = vrot.lane.b32.xlu1 %v1039_v4, %s980_s14 }
 0x3c0   :  { %272 = vrot.lane.b32.xlu1 %v1034_v3, %s980_s14 }
 0x3c8   :  { %392 = vrot.lane.b32.xlu1 %v1074_v21, %s979_s13 }
 0x3fb   :  { %v334_v58 = vpop.xlane.xlu2 %333 }
 0x3fc   :  { %925 = vrcp.f32 %v334_v58 }
 0x402   :  { %v926_v59 = vpop.eup %925 }
 0x403   :  { %v336_v60 = vmul.f32 %v926_v59, %v922_v48  ;;  %v364_v4 = vpop.permute.xlu2 %363 }
 0x405   :  { %873 = vmatmul.msk.f32.vlgmr.msrb.gmra.mxu1 %vm117_vm1, %v336_v60 }
 0x40a   :  { %v217_v61 = vpop.xlane.xlu1 %216 }
 0x40b   :  { %927 = vrcp.f32 %v217_v61  ;;  %v525_v6 = vpop.permute.xlu2 %524 }
 0x411   :  { %v928_v62 = vpop.eup %927 }
 0x412   :  { %v219_v0 = vmul.f32 %v928_v62, %v924_v53 }
 0x422   :  { %v221_v63 = vpop.permute.xlu1 %220 }
 0x423   :  { %241 = vmatpush.msrb.mxu2 %v221_v63 }
 0x424   :  { %868 = vmatmul.msk.f32.vlgmr.msrb.gmra.mxu2 %vm117_vm1, %v219_v0 }
 0x42a   :  { %v247_v2 = vpop.permute.xlu1 %246 }
 0x42b   :  { %267 = vmatpush.msra.mxu3 %v247_v2 }
 0x42d   :  { %384 = vmatpush.msrb.mxu3 %v364_v4 }
 0x432   :  { %v273_v3 = vpop.permute.xlu1 %272 }
 0x433   :  { %293 = vmatpush.msra.mxu2 %v273_v3 }
 0x434   :  { %870 = vmatmul.msk.f32.vlgmr.msra.gmra.mxu2 %vm117_vm1, %v178_v42 }
 0x43a   :  { %v393_v5 = vpop.permute.xlu1 %392 }
 0x43b   :  { %875 = vmatpush.xpose.msk.msrb.mxu2 %vm117_vm1, %v393_v5 }
 0x43e   :  { %876 = vmatmul.msk.f32.vlgmr.msrb.gmra.mxu2 %vm117_vm1, %v391_v8 }
 0x43f   :  { %545 = vmatpush.msra.mxu2 %v525_v6 }
 0x441   :  { %656 = vmatpush.msrb.mxu2 %v273_v3 }
 0x482   :  { %v360_v10 = vpop.f32.mrf.mxu1 }
 0x4a7   :  { %v243_v9 = vpop.f32.mrf.mxu2 }
 0x4a8   :  { %869 = vmatmul.msk.f32.vlgmr.msra.gmra.mxu3 %vm117_vm1, %v243_v9 }
 0x4a9   :  { %879 = vmatpush.xpose.msk.msra.mxu3 %vm117_vm1, %v1111_v57 }
 0x4b0   :  { %874 = vmatmul.msk.f32.vlgmr.msrb.gmra.mxu3 %vm117_vm1, %v360_v10 }
 0x4b1   :  { %633 = vmatpush.msrb.mxu3 %v247_v2 }
 0x4b7   :  { %v295_v13 = vpop.f32.mrf.mxu2 }
 0x4b8   :  { %880 = vmatmul.msk.f32.vlgmr.msra.gmra.mxu3 %vm117_vm1, %v68_v12 }
 0x4b9   :  { %744 = vmatpush.msra.mxu3 %v364_v4 }
 0x4c1   :  { %v415_v14 = vpop.f32.mrf.mxu2 }
 0x4c2   :  { %v418_v15 = vsel %vm117_vm1, %v415_v14, -inf }
 0x4c3   :  { %419 = vmax.xlane.f32.xlu2 %v418_v15 }
 0x4db   :  { %550 = vrot.lane.b32.xlu2 %v68_v12, %s976_s2 }
 0x4e3   :  { %750 = vrot.lane.b32.xlu2 %v68_v12, %s979_s13 }
 0x52b   :  { %v269_v16 = vpop.f32.mrf.mxu3 }
 0x52c   :  { %v296_v17 = vadd.f32 %v295_v13, %v269_v16 }
 0x533   :  { %v386_v18 = vpop.f32.mrf.mxu3 }
 0x534   :  { %v1139_v19 = vadd.f32 %v386_v18, %v296_v17 }
 0x536   :  { %v420_v22 = vpop.xlane.xlu2 %419 }
 0x537   :  { %v421_v23 = vsub.f32 %v415_v14, %v420_v22 }
 0x539   :  { %v422_v20 = vmul.f32 1.442695, %v421_v23 }
 0x53b   :  { %929 = vpow2.f32 %v422_v20  ;;  %v510_v24 = vpop.f32.mrf.mxu3 }
 0x53c   :  { %v513_v25 = vsel %vm117_vm1, %v510_v24, -inf }
 0x53d   :  { %514 = vmax.xlane.f32.xlu1 %v513_v25 }
 0x53e   :  { %v551_v41 = vpop.permute.xlu2 %550 }
 0x541   :  { %v930_v26 = vpop.eup %929 }
 0x542   :  { %v424_v27 = vsel %vm117_vm1, %v930_v26, 0.0 }
 0x545   :  { %425 = vadd.xlane.f32.xlu1 %v424_v27 }
 0x546   :  { %v751_v46 = vpop.permute.xlu2 %750 }
 0x55e   :  { %552 = vrot.lane.b32.xlu1 %v1111_v57, %s976_s2 }
 0x566   :  { %661 = vrot.lane.b32.xlu1 %v68_v12, %s977_s0 }
 0x5b0   :  { %v515_v28 = vpop.xlane.xlu1 %514 }
 0x5b1   :  { %v516_v29 = vsub.f32 %v510_v24, %v515_v28 }
 0x5b3   :  { %v517_v30 = vmul.f32 1.442695, %v516_v29 }
 0x5b5   :  { %931 = vpow2.f32 %v517_v30 }
 0x5b8   :  { %v426_v35 = vpop.xlane.xlu1 %425 }
 0x5bb   :  { %v932_v31 = vpop.eup %931 }
 0x5bc   :  { %v519_v32 = vsel %vm117_vm1, %v932_v31, 0.0 }
 0x5bd   :  { %520 = vadd.xlane.f32.xlu0 %v519_v32 }
 0x5d0   :  { %v553_v40 = vpop.permute.xlu1 %552 }
 0x5d1   :  { %429 = vrot.lane.b32.xlu0 %v1074_v21, %s982_s16 }
 0x5d8   :  { %v662_v43 = vpop.permute.xlu1 %661 }
 0x5d9   :  { %663 = vrot.lane.b32.xlu0 %v1111_v57, %s977_s0 }
 0x5e1   :  { %752 = vrot.lane.b32.xlu0 %v1111_v57, %s979_s13 }
 0x630   :  { %v521_v33 = vpop.xlane.xlu0 %520 }
 0x631   :  { %933 = vrcp.f32 %v521_v33 }
 0x632   :  { %935 = vrcp.f32 %v426_v35 }
 0x637   :  { %v934_v34 = vpop.eup %933 }
 0x638   :  { %v523_v36 = vmul.f32 %v934_v34, %v932_v31  ;;  %v936_v37 = vpop.eup %935 }
 0x639   :  { %v428_v38 = vmul.f32 %v936_v37, %v930_v26 }
 0x63a   :  { %881 = vmatmul.msk.f32.vlgmr.msra.gmra.mxu2 %vm117_vm1, %v523_v36 }
 0x643   :  { %v430_v39 = vpop.permute.xlu0 %429 }
 0x644   :  { %450 = vmatpush.msra.mxu0 %v430_v39 }
 0x645   :  { %877 = vmatmul.msk.f32.vlgmr.msra.gmra.mxu0 %vm117_vm1, %v428_v38 }
 0x646   :  { %882 = vmatpush.xpose.msk.msrb.mxu0 %vm117_vm1, %v553_v40 }
 0x64b   :  { %v664_v21 = vpop.permute.xlu0 %663 }
 0x64c   :  { %887 = vmatpush.xpose.msk.msra.mxu0 %vm117_vm1, %v664_v21 }
 0x64d   :  { %883 = vmatmul.msk.f32.vlgmr.msrb.gmra.mxu0 %vm117_vm1, %v551_v41 }
 0x653   :  { %v753_v42 = vpop.permute.xlu0 %752 }
 0x654   :  { %891 = vmatpush.xpose.msk.msra.mxu2 %vm117_vm1, %v753_v42 }
 0x655   :  { %888 = vmatmul.msk.f32.vlgmr.msra.gmra.mxu0 %vm117_vm1, %v662_v43 }
 0x6bd   :  { %v547_v44 = vpop.f32.mrf.mxu2 }
 0x6be   :  { %886 = vmatmul.msk.f32.vlgmr.msrb.gmra.mxu2 %vm117_vm1, %v547_v44 }
 0x6c2   :  { %v452_v45 = vpop.f32.mrf.mxu0 }
 0x6c6   :  { %892 = vmatmul.msk.f32.vlgmr.msra.gmra.mxu2 %vm117_vm1, %v751_v46 }
 0x6ca   :  { %v575_v47 = vpop.f32.mrf.mxu0 }
 0x6cb   :  { %v578_v48 = vsel %vm117_vm1, %v575_v47, -inf }
 0x6cc   :  { %579 = vmax.xlane.f32.xlu0 %v578_v48 }
 0x6d2   :  { %v686_v49 = vpop.f32.mrf.mxu0 }
 0x6d3   :  { %v689_v50 = vsel %vm117_vm1, %v686_v49, -inf }
 0x6d4   :  { %690 = vmax.xlane.f32.xlu1 %v689_v50 }
 0x6ed   :  { %455 = vrot.lane.b32.xlu1 %v1024_v1, %s980_s14 }
 0x6f5   :  { %789 = vrot.lane.b32.xlu1 %v1111_v57, %s982_s16 }
 0x73f   :  { %v580_v51 = vpop.xlane.xlu0 %579 }
 0x740   :  { %v581_v52 = vsub.f32 %v575_v47, %v580_v51 }
 0x741   :  { %v1168_v53 = vpop.f32.mrf.mxu2 }
 0x742   :  { %v582_v54 = vmul.f32 1.442695, %v581_v52 }
 0x744   :  { %937 = vpow2.f32 %v582_v54 }
 0x747   :  { %v691_v55 = vpop.xlane.xlu1 %690 }
 0x748   :  { %v692_v56 = vsub.f32 %v686_v49, %v691_v55 }
 0x749   :  { %v775_v58 = vpop.f32.mrf.mxu2 }
 0x74a   :  { %v938_v59 = vpop.eup %937  ;;  %v693_v60 = vmul.f32 1.442695, %v692_v56  ;;  %v778_v61 = vsel %vm117_vm1, %v775_v58, -inf }
 0x74b   :  { %779 = vmax.xlane.f32.xlu2 %v778_v61  ;;  %v584_v62 = vsel %vm117_vm1, %v938_v59, 0.0 }
 0x74c   :  { %939 = vpow2.f32 %v693_v60  ;;  %585 = vadd.xlane.f32.xlu0 %v584_v62 }
 0x752   :  { %v940_v1 = vpop.eup %939 }
 0x753   :  { %v695_v63 = vsel %vm117_vm1, %v940_v1, 0.0 }
 0x754   :  { %696 = vadd.xlane.f32.xlu2 %v695_v63 }
 0x75f   :  { %v456_v0 = vpop.permute.xlu1 %455 }
 0x760   :  { %476 = vmatpush.msra.mxu1 %v456_v0  ;;  %589 = vrot.lane.b32.xlu0 %v1111_v57, %s981_s15 }
 0x761   :  { %878 = vmatmul.msk.f32.vlgmr.msra.gmra.mxu1 %vm117_vm1, %v452_v45 }
 0x767   :  { %v790_v2 = vpop.permute.xlu1 %789 }
 0x768   :  { %810 = vmatpush.msrb.mxu0 %v790_v2  ;;  %482 = vrot.lane.b32.xlu0 %v1053_v7, %s980_s14 }
 0x7be   :  { %v780_v4 = vpop.xlane.xlu2 %779 }
 0x7bf   :  { %v781_v3 = vsub.f32 %v775_v58, %v780_v4  ;;  %v586_v6 = vpop.xlane.xlu0 %585 }
 0x7c1   :  { %v782_v5 = vmul.f32 1.442695, %v781_v3 }
 0x7c3   :  { %941 = vpow2.f32 %v782_v5 }
 0x7c4   :  { %943 = vrcp.f32 %v586_v6 }
 0x7c7   :  { %v697_v16 = vpop.xlane.xlu2 %696 }
 0x7c8   :  { %945 = vrcp.f32 %v697_v16 }
 0x7c9   :  { %v942_v8 = vpop.eup %941 }
 0x7ca   :  { %v784_v9 = vsel %vm117_vm1, %v942_v8, 0.0  ;;  %v944_v10 = vpop.eup %943 }
 0x7cb   :  { %785 = vadd.xlane.f32.xlu2 %v784_v9  ;;  %v588_v11 = vmul.f32 %v944_v10, %v938_v59 }
 0x7ce   :  { %v946_v18 = vpop.eup %945 }
 0x7cf   :  { %v699_v23 = vmul.f32 %v946_v18, %v940_v1 }
 0x7d2   :  { %v590_v12 = vpop.permute.xlu0 %589 }
 0x7d3   :  { %610 = vmatpush.msrb.mxu1 %v590_v12 }
 0x7d4   :  { %884 = vmatmul.msk.f32.vlgmr.msrb.gmra.mxu1 %vm117_vm1, %v588_v11 }
 0x7da   :  { %v483_v14 = vpop.permute.xlu0 %482 }
 0x7de   :  { %v478_v13 = vpop.f32.mrf.mxu1 }
 0x7df   :  { %v481_v7 = vadd.f32 %v478_v13, %v1139_v19 }
 0x7e1   :  { %v485_v15 = vadd.f32 %v483_v14, %v481_v7 }
 0x7e3   :  { %486 = vst.msk [vmem:[#allocation3] sm:$0xff] %vm36_vm0, %v485_v15  ;;  %700 = vrot.lane.b32.xlu2 %v1111_v57, %s978_s1 }
 0x83e   :  { %v786_v17 = vpop.xlane.xlu2 %785 }
 0x83f   :  { %947 = vrcp.f32 %v786_v17 }
 0x845   :  { %v948_v22 = vpop.eup %947 }
 0x846   :  { %v788_v20 = vmul.f32 %v948_v22, %v942_v8  ;;  %v701_v24 = vpop.permute.xlu2 %700 }
 0x847   :  { %721 = vmatpush.msra.mxu1 %v701_v24 }
 0x848   :  { %889 = vmatmul.msk.f32.vlgmr.msra.gmra.mxu1 %vm117_vm1, %v699_v23  ;;  %893 = vmatmul.msk.f32.vlgmr.msrb.gmra.mxu0 %vm117_vm1, %v788_v20 }
 0x849   :  { %833 = vmatpush.msrb.mxu1 %v456_v0 }
 0x851   :  { %v612_v19 = vpop.f32.mrf.mxu1 }
 0x852   :  { %885 = vmatmul.msk.f32.vlgmr.msrb.gmra.mxu3 %vm117_vm1, %v612_v19 }
 0x8c5   :  { %v723_v25 = vpop.f32.mrf.mxu1  ;;  %v812_v57 = vpop.f32.mrf.mxu0 }
 0x8c6   :  { %890 = vmatmul.msk.f32.vlgmr.msra.gmra.mxu3 %vm117_vm1, %v723_v25  ;;  %894 = vmatmul.msk.f32.vlgmr.msrb.gmra.mxu1 %vm117_vm1, %v812_v57 }
 0x8d5   :  { %v635_v26 = vpop.f32.mrf.mxu3 }
 0x8d6   :  { %v659_v27 = vadd.f32 %v1168_v53, %v635_v26 }
 0x943   :  { %v835_v30 = vpop.f32.mrf.mxu1 }
 0x949   :  { %v746_v28 = vpop.f32.mrf.mxu3 }
 0x94a   :  { %v749_v29 = vadd.f32 %v746_v28, %v659_v27 }
 0x94c   :  { %v838_v31 = vadd.f32 %v835_v30, %v749_v29 }
 0x94e   :  { %v839_v32 = vadd.f32 %v838_v31, %v483_v14 }
 0x950   :  { %840 = vst.msk [vmem:[#allocation3 + $0x8] sm:$0xff] %vm36_vm0, %v839_v32 }
 0x951   :  { %853 = dma.vmem_to_hbm [thread:$0]  %s846_s18, 256, %s848_s21, [#allocation4], %s984_s22, %s984_s22, %s985_s23  }
 0x952   :  { %973 = dma.done.wait [#allocation4], 256  }
 0x953   :  { %974 = vsyncadd [#allocation4], 4294967040 }
 0x954   :  { %858 = vsyncpa [#allocation4], 1 }

</bundles_post_ra>
